<compile_context>
chip_gen: v7x
topology: tpu7x:2x2x1
jax: 0.10.0
libtpu: 0.0.40
codegen_flags: <defaults>
</compile_context>

<pallas_src>
import jax
import jax.numpy as jnp
from jax.experimental import pallas as pl
from jax.experimental.pallas import tpu as pltpu

BN_EPS = 1e-5
LEAKY_SLOPE = 0.01  # nn.LeakyReLU default negative_slope

# Cached result of the pl.Buffered(1) capability probe (None = not probed yet).
_SINGLE_BUFFER_WEIGHTS_OK = None


def _leaky_relu(x):
    return jnp.where(x > 0, x, LEAKY_SLOPE * x)


def _round_up(n, m):
    return ((n + m - 1) // m) * m


def _cdiv(a, b):
    return (a + b - 1) // b


# ---------------------------------------------------------------------------
# Kernel: grid = (batch tiles, K tiles over input_size).
# Layer-1 matmul is accumulated over the K axis into an f32 scratch; on the
# last K step the bias/LeakyReLU and the remaining two layers run fused.
# ---------------------------------------------------------------------------
def mlp_kernel(x_ref, w1_ref, b_ref, w2_ref, w3_ref, out_ref, acc_ref):
    H1 = w1_ref.shape[1]
    H2 = w2_ref.shape[1]
    NC = w3_ref.shape[1]
    k = pl.program_id(1)

    @pl.when(k == 0)
    def _():
        acc_ref[...] = jnp.zeros_like(acc_ref)

    # Layer 1 partial product (x already bf16; f32 accumulation on the MXU).
    acc_ref[...] += jnp.dot(x_ref[...], w1_ref[...],
                            preferred_element_type=jnp.float32)

    @pl.when(k == pl.num_programs(1) - 1)
    def _():
        b1 = b_ref[0:1, 0:H1]
        b2 = b_ref[1:2, 0:H2]
        b3 = b_ref[2:3, 0:NC]

        # Layer 1: (+ folded BN) bias + LeakyReLU.  Dropout = identity (eval).
        h = _leaky_relu(acc_ref[...] + b1)

        # Layer 2: Linear (+ folded BN) + LeakyReLU.  Dropout = identity (eval).
        h = jnp.dot(h.astype(w2_ref.dtype), w2_ref[...],
                    preferred_element_type=jnp.float32) + b2
        h = _leaky_relu(h)

        # Classifier head: Linear.
        out = jnp.dot(h.astype(w3_ref.dtype), w3_ref[...],
                      preferred_element_type=jnp.float32) + b3
        out_ref[...] = out.astype(out_ref.dtype)


# ---------------------------------------------------------------------------
# Host-side parameter prep: fold eval-mode BN into the preceding Linear, cast
# MXU-feeding weights to bf16, and coalesce the three biases into one block.
# ---------------------------------------------------------------------------
def fold_bn_params(p, weight_dtype=jnp.bfloat16):
    scale1 = p["g1"] * jax.lax.rsqrt(p["v1"] + BN_EPS)            # (1, H1)
    w1f = (p["w1"] * scale1).astype(weight_dtype)                  # (IN, H1)
    b1f = ((p["b1"] - p["m1"]) * scale1 + p["be1"]).reshape(-1)    # (H1,) f32

    scale2 = p["g2"] * jax.lax.rsqrt(p["v2"] + BN_EPS)             # (1, H2)
    w2f = (p["w2"] * scale2).astype(weight_dtype)                  # (H1, H2)
    b2f = ((p["b2"] - p["m2"]) * scale2 + p["be2"]).reshape(-1)    # (H2,) f32

    b3 = p["b3"].reshape(-1)                                       # (NC,) f32

    H1, H2, NC = b1f.shape[0], b2f.shape[0], b3.shape[0]
    hmax = max(H1, H2, NC)
    biases = jnp.zeros((3, hmax), jnp.float32)
    biases = biases.at[0, :H1].set(b1f)
    biases = biases.at[1, :H2].set(b2f)
    biases = biases.at[2, :NC].set(b3)

    return dict(w1=w1f, w2=w2f, w3=p["w3"].astype(weight_dtype), b=biases)


# ---------------------------------------------------------------------------
# Tile-size / VMEM helpers.
# ---------------------------------------------------------------------------
def _choose_batch_tile(B, tb):
    """>=2 batch tiles when B is moderate (v7x megacore), pad bounded by TB."""
    tb = max(8, _round_up(tb, 8))
    if B <= 16:
        return _round_up(B, 8)                       # tiny batch: single tile
    n_tiles = max(2, _cdiv(B, tb))
    return min(tb, _round_up(_cdiv(B, n_tiles), 8))


def _vmem_block_bytes(rows, cols, dtype):
    return (_round_up(max(int(rows), 1), 8)
            * _round_up(max(int(cols), 1), 128)
            * jnp.dtype(dtype).itemsize)


def _estimate_vmem_limit(TB, TK, H1, H2, NC, bias_shape, n_k, single_buffer):
    wbuf = 1 if single_buffer else 2
    w1buf = wbuf if n_k == 1 else 2
    total = (
        2 * _vmem_block_bytes(TB, TK, jnp.bfloat16)                # x stream
        + w1buf * _vmem_block_bytes(TK, H1, jnp.bfloat16)          # w1
        + wbuf * _vmem_block_bytes(bias_shape[0], bias_shape[1], jnp.float32)
        + wbuf * _vmem_block_bytes(H1, H2, jnp.bfloat16)           # w2
        + wbuf * _vmem_block_bytes(H2, NC, jnp.bfloat16)           # w3
        + 2 * _vmem_block_bytes(TB, NC, jnp.float32)               # out
        + _vmem_block_bytes(TB, H1, jnp.float32)                   # acc scratch
    )
    # 2x margin + compiler-scratch headroom; cap at the smallest physical VMEM
    # across v5e/v6e/v7x (64 MiB per TensorCore).
    return int(min(max(2 * total + (4 << 20), 16 << 20), 64 << 20))


# ---------------------------------------------------------------------------
# Wrapper: pad batch / feature dims, stream bf16 batch tiles over a
# (batch, K-reduction) grid, keep the small weights resident in VMEM.
# ---------------------------------------------------------------------------
def text_classifier_forward(x, folded, *, tb=256, tk=512):
    """x: (B, input_size) f32.  folded: output of fold_bn_params()."""
    global _SINGLE_BUFFER_WEIGHTS_OK

    B, IN = x.shape
    w1, w2, w3, biases = folded["w1"], folded["w2"], folded["w3"], folded["b"]
    H1, H2, NC = w1.shape[1], w2.shape[1], w3.shape[1]
    assert w1.shape[0] == IN

    # Batch tiling.
    TB = _choose_batch_tile(B, tb)
    B_pad = _round_up(B, TB)
    n_b = B_pad // TB

    # K tiling over input_size (only when IN is wide).
    if IN > tk:
        TK = _round_up(tk, 128)       # x's lane dim must be a multiple of 128
        IN_pad = _round_up(IN, TK)
    else:
        TK, IN_pad = IN, IN
    n_k = IN_pad // TK

    # Stream x as bf16; zero-pad batch tail and (if K-tiled) the feature dim.
    x = x.astype(jnp.bfloat16)
    if (B_pad, IN_pad) != (B, IN):
        x = jnp.pad(x, ((0, B_pad - B), (0, IN_pad - IN)))
    if IN_pad != IN:
        w1 = jnp.pad(w1, ((0, IN_pad - IN), (0, 0)))   # zero rows: no-op terms

    def run(single_buffer_weights):
        resident_mode = pl.Buffered(1) if single_buffer_weights else None
        w1_mode = resident_mode if n_k == 1 else None  # w1 changes across k

        def spec(shape, index_map, mode=None):
            if mode is None:
                return pl.BlockSpec(shape, index_map)
            return pl.BlockSpec(shape, index_map, pipeline_mode=mode)

        in_specs = [
            spec((TB, TK), lambda i, k: (i, k)),                     # x stream
            spec((TK, H1), lambda i, k: (k, 0), w1_mode),            # w1'
            spec(biases.shape, lambda i, k: (0, 0), resident_mode),  # biases
            spec((H1, H2), lambda i, k: (0, 0), resident_mode),      # w2'
            spec((H2, NC), lambda i, k: (0, 0), resident_mode),      # w3
        ]
        out_spec = spec((TB, NC), lambda i, k: (i, 0))

        vmem_limit = _estimate_vmem_limit(TB, TK, H1, H2, NC, biases.shape,
                                          n_k, single_buffer_weights)
        return pl.pallas_call(
            mlp_kernel,
            out_shape=jax.ShapeDtypeStruct((B_pad, NC), jnp.float32),
            grid_spec=pltpu.PrefetchScalarGridSpec(
                num_scalar_prefetch=0,
                grid=(n_b, n_k),                  # reduction axis last
                in_specs=in_specs,
                out_specs=out_spec,
                scratch_shapes=[pltpu.VMEM((TB, H1), jnp.float32)],
            ),
            compiler_params=pltpu.CompilerParams(
                dimension_semantics=("parallel", "arbitrary"),
                vmem_limit_bytes=vmem_limit,
            ),
        )(x, w1, biases, w2, w3)

    if _SINGLE_BUFFER_WEIGHTS_OK is None:
        try:
            out = jax.block_until_ready(run(True))
            _SINGLE_BUFFER_WEIGHTS_OK = True
        except Exception:
            # TODO(synk): pl.Buffered(1) single-buffering rejected by this jax
            # version; fall back to default double-buffering (correct, more VMEM).
            _SINGLE_BUFFER_WEIGHTS_OK = False
            out = run(False)
    else:
        out = run(_SINGLE_BUFFER_WEIGHTS_OK)

    return out[:B]


# ---------------------------------------------------------------------------
# Synthetic parameters (PyTorch-layout semantics; Linear weights as (in, out)).
# ---------------------------------------------------------------------------
def init_params(key, input_size, hidden_size1, hidden_size2, num_classes):
    ks = jax.random.split(key, 8)

    def lin(kw, kb, fan_in, fan_out):
        bound = 1.0 / jnp.sqrt(fan_in)
        w = jax.random.uniform(kw, (fan_in, fan_out), jnp.float32, -bound, bound)
        b = jax.random.uniform(kb, (1, fan_out), jnp.float32, -bound, bound)
        return w, b

    w1, b1 = lin(ks[0], ks[1], input_size, hidden_size1)
    w2, b2 = lin(ks[2], ks[3], hidden_size1, hidden_size2)
    w3, b3 = lin(ks[4], ks[5], hidden_size2, num_classes)

    def bn(krm, n):
        g = jnp.ones((1, n), jnp.float32)
        be = jnp.zeros((1, n), jnp.float32)
        m = 0.1 * jax.random.normal(krm, (1, n), jnp.float32)
        v = jnp.ones((1, n), jnp.float32) + 0.05 * jnp.abs(
            jax.random.normal(jax.random.fold_in(krm, 1), (1, n), jnp.float32)
        )
        return g, be, m, v

    g1, be1, m1, v1 = bn(ks[6], hidden_size1)
    g2, be2, m2, v2 = bn(ks[7], hidden_size2)

    return dict(
        w1=w1, b1=b1, g1=g1, be1=be1, m1=m1, v1=v1,
        w2=w2, b2=b2, g2=g2, be2=be2, m2=m2, v2=v2,
        w3=w3, b3=b3,
    )


def reference_forward(x, p):
    """Plain-JAX f32 reference with the original (un-folded) module semantics."""
    h = x @ p["w1"] + p["b1"]
    h = (h - p["m1"]) * (p["g1"] * jax.lax.rsqrt(p["v1"] + BN_EPS)) + p["be1"]
    h = jnp.where(h > 0, h, LEAKY_SLOPE * h)
    h = h @ p["w2"] + p["b2"]
    h = (h - p["m2"]) * (p["g2"] * jax.lax.rsqrt(p["v2"] + BN_EPS)) + p["be2"]
    h = jnp.where(h > 0, h, LEAKY_SLOPE * h)
    return h @ p["w3"] + p["b3"]


if __name__ == "__main__":
    key = jax.random.PRNGKey(0)

    # Case 1: small shapes; exercises batch tiling (3 batch tiles) + tail pad.
    B, INPUT, H1, H2, NUM_CLASSES = 20, 32, 64, 32, 8
    kx, kp, key = jax.random.split(key, 3)
    x = jax.random.normal(kx, (B, INPUT), jnp.float32)
    params = init_params(kp, INPUT, H1, H2, NUM_CLASSES)
    folded = fold_bn_params(params)
    out = jax.block_until_ready(text_classifier_forward(x, folded, tb=8))
    ref = reference_forward(x, params)
    assert out.shape == (B, NUM_CLASSES)
    # Loose tolerance: bf16 x / bf16 BN-folded weights (f32 MXU accumulation)
    # vs a pure-f32 reference -> logits differ at ~1e-2 level.
    assert jnp.allclose(out, ref, atol=1e-1, rtol=1e-1), "mismatch (case 1)"

    # Case 2: wider feature vector; exercises the K-reduction axis over IN
    # (tk=128 -> 3 K steps) including zero-padding IN from 300 to 384, and a
    # 2-tile batch grid (v7x megacore path).
    B2, IN2 = 24, 300
    kx2, kp2 = jax.random.split(key)
    x2 = jax.random.normal(kx2, (B2, IN2), jnp.float32)
    params2 = init_params(kp2, IN2, 64, 32, 8)
    folded2 = fold_bn_params(params2)
    out2 = jax.block_until_ready(
        text_classifier_forward(x2, folded2, tb=256, tk=128))
    ref2 = reference_forward(x2, params2)
    assert out2.shape == (B2, 8)
    assert jnp.allclose(out2, ref2, atol=1e-1, rtol=1e-1), "mismatch (case 2)"

    print("KERNEL_OK")
</pallas_src>

<mosaic_0001>
module attributes {stable_mosaic.version = 11 : i64} {
  func.func @mlp_kernel(%arg0: i32, %arg1: i32, %arg2: memref<8x32xbf16, #tpu.memory_space<vmem>>, %arg3: memref<32x64xbf16, #tpu.memory_space<vmem>>, %arg4: memref<3x64xf32, #tpu.memory_space<vmem>>, %arg5: memref<64x32xbf16, #tpu.memory_space<vmem>>, %arg6: memref<32x8xbf16, #tpu.memory_space<vmem>>, %arg7: memref<8x8xf32, #tpu.memory_space<vmem>>, %arg8: memref<8x64xf32, #tpu.memory_space<vmem>>) attributes {dimension_semantics = [#tpu.dimension_semantics<parallel>, #tpu.dimension_semantics<arbitrary>], iteration_bounds = array<i64: 3, 1>, scalar_prefetch = 0 : i64, scratch_operands = 1 : i64, tpu.core_type = #tpu.core_type<tc>, window_params = [{transform_indices = @transform_0, window_bounds = array<i64: 8, 32>}, {pipeline_mode = #tpu.pipeline_mode<synchronous>, transform_indices = @transform_1, window_bounds = array<i64: 32, 64>}, {pipeline_mode = #tpu.pipeline_mode<synchronous>, transform_indices = @transform_2, window_bounds = array<i64: 3, 64>}, {pipeline_mode = #tpu.pipeline_mode<synchronous>, transform_indices = @transform_3, window_bounds = array<i64: 64, 32>}, {pipeline_mode = #tpu.pipeline_mode<synchronous>, transform_indices = @transform_4, window_bounds = array<i64: 32, 8>}, {transform_indices = @transform_5, window_bounds = array<i64: 8, 8>}]} {
    %c0_i32 = arith.constant 0 : i32
    %0 = arith.cmpi eq, %arg1, %c0_i32 : i32
    %1 = arith.extui %0 : i1 to i32
    %c0_i32_0 = arith.constant 0 : i32
    %2 = arith.cmpi ne, %1, %c0_i32_0 : i32
    scf.if %2 {
      %cst_10 = arith.constant 0.000000e+00 : f32
      %12 = vector.broadcast %cst_10 : f32 to vector<8x64xf32>
      %c0_11 = arith.constant 0 : index
      %c0_12 = arith.constant 0 : index
      %13 = vector.load %arg8[%c0_11, %c0_12] : memref<8x64xf32, #tpu.memory_space<vmem>>, vector<8x64xf32>
      tpu.vector_store %arg8[%c0_11, %c0_12], %12 {strides = array<i32>} : memref<8x64xf32, #tpu.memory_space<vmem>>, vector<8x64xf32>,
    } else {
    }
    %c0 = arith.constant 0 : index
    %c0_1 = arith.constant 0 : index
    %3 = vector.load %arg8[%c0, %c0_1] : memref<8x64xf32, #tpu.memory_space<vmem>>, vector<8x64xf32>
    %c0_2 = arith.constant 0 : index
    %c0_3 = arith.constant 0 : index
    %4 = vector.load %arg2[%c0_2, %c0_3] : memref<8x32xbf16, #tpu.memory_space<vmem>>, vector<8x32xbf16>
    %c0_4 = arith.constant 0 : index
    %c0_5 = arith.constant 0 : index
    %5 = vector.load %arg3[%c0_4, %c0_5] : memref<32x64xbf16, #tpu.memory_space<vmem>>, vector<32x64xbf16>
    %cst = arith.constant dense<0.000000e+00> : vector<8x64xf32>
    %6 = tpu.matmul %4, %5, %cst {dimension_numbers = #tpu.dot_dimension_numbers<[1], [0], [0], [1], [0, 0, 1, 1], [], []>} : vector<8x32xbf16>, vector<32x64xbf16>, vector<8x64xf32> -> vector<8x64xf32>
    %7 = arith.addf %3, %6 : vector<8x64xf32>
    %c0_6 = arith.constant 0 : index
    %c0_7 = arith.constant 0 : index
    %8 = vector.load %arg8[%c0_6, %c0_7] : memref<8x64xf32, #tpu.memory_space<vmem>>, vector<8x64xf32>
    tpu.vector_store %arg8[%c0_6, %c0_7], %7 {strides = array<i32>} : memref<8x64xf32, #tpu.memory_space<vmem>>, vector<8x64xf32>,
    %c0_i32_8 = arith.constant 0 : i32
    %9 = arith.cmpi eq, %arg1, %c0_i32_8 : i32
    %10 = arith.extui %9 : i1 to i32
    %c0_i32_9 = arith.constant 0 : i32
    %11 = arith.cmpi ne, %10, %c0_i32_9 : i32
    scf.if %11 {
      %c0_10 = arith.constant 0 : index
      %c0_11 = arith.constant 0 : index
      %12 = vector.load %arg4[%c0_10, %c0_11] : memref<3x64xf32, #tpu.memory_space<vmem>>, vector<1x64xf32>
      %c1 = arith.constant 1 : index
      %c0_12 = arith.constant 0 : index
      %13 = vector.load %arg4[%c1, %c0_12] : memref<3x64xf32, #tpu.memory_space<vmem>>, vector<1x32xf32>
      %c2 = arith.constant 2 : index
      %c0_13 = arith.constant 0 : index
      %14 = vector.load %arg4[%c2, %c0_13] : memref<3x64xf32, #tpu.memory_space<vmem>>, vector<1x8xf32>
      %c0_14 = arith.constant 0 : index
      %c0_15 = arith.constant 0 : index
      %15 = vector.load %arg8[%c0_14, %c0_15] : memref<8x64xf32, #tpu.memory_space<vmem>>, vector<8x64xf32>
      %16 = vector.broadcast %12 : vector<1x64xf32> to vector<8x64xf32>
      %17 = arith.addf %15, %16 : vector<8x64xf32>
      %cst_16 = arith.constant 0.000000e+00 : f32
      %18 = vector.broadcast %cst_16 : f32 to vector<8x64xf32>
      %19 = arith.cmpf ogt, %17, %18 : vector<8x64xf32>
      %cst_17 = arith.constant 0.00999999977 : f32
      %20 = vector.broadcast %cst_17 : f32 to vector<8x64xf32>
      %21 = arith.mulf %20, %17 : vector<8x64xf32>
      %22 = arith.select %19, %17, %21 : vector<8x64xi1>, vector<8x64xf32>
      %23 = arith.truncf %22 : vector<8x64xf32> to vector<8x64xbf16>
      %c0_18 = arith.constant 0 : index
      %c0_19 = arith.constant 0 : index
      %24 = vector.load %arg5[%c0_18, %c0_19] : memref<64x32xbf16, #tpu.memory_space<vmem>>, vector<64x32xbf16>
      %cst_20 = arith.constant dense<0.000000e+00> : vector<8x32xf32>
      %25 = tpu.matmul %23, %24, %cst_20 {dimension_numbers = #tpu.dot_dimension_numbers<[1], [0], [0], [1], [0, 0, 1, 1], [], []>} : vector<8x64xbf16>, vector<64x32xbf16>, vector<8x32xf32> -> vector<8x32xf32>
      %26 = vector.broadcast %13 : vector<1x32xf32> to vector<8x32xf32>
      %27 = arith.addf %25, %26 : vector<8x32xf32>
      %cst_21 = arith.constant 0.000000e+00 : f32
      %28 = vector.broadcast %cst_21 : f32 to vector<8x32xf32>
      %29 = arith.cmpf ogt, %27, %28 : vector<8x32xf32>
      %cst_22 = arith.constant 0.00999999977 : f32
      %30 = vector.broadcast %cst_22 : f32 to vector<8x32xf32>
      %31 = arith.mulf %30, %27 : vector<8x32xf32>
      %32 = arith.select %29, %27, %31 : vector<8x32xi1>, vector<8x32xf32>
      %33 = arith.truncf %32 : vector<8x32xf32> to vector<8x32xbf16>
      %c0_23 = arith.constant 0 : index
      %c0_24 = arith.constant 0 : index
      %34 = vector.load %arg6[%c0_23, %c0_24] : memref<32x8xbf16, #tpu.memory_space<vmem>>, vector<32x8xbf16>
      %cst_25 = arith.constant dense<0.000000e+00> : vector<8x8xf32>
      %35 = tpu.matmul %33, %34, %cst_25 {dimension_numbers = #tpu.dot_dimension_numbers<[1], [0], [0], [1], [0, 0, 1, 1], [], []>} : vector<8x32xbf16>, vector<32x8xbf16>, vector<8x8xf32> -> vector<8x8xf32>
      %36 = vector.broadcast %14 : vector<1x8xf32> to vector<8x8xf32>
      %37 = arith.addf %35, %36 : vector<8x8xf32>
      %c0_26 = arith.constant 0 : index
      %c0_27 = arith.constant 0 : index
      %38 = vector.load %arg7[%c0_26, %c0_27] : memref<8x8xf32, #tpu.memory_space<vmem>>, vector<8x8xf32>
      tpu.vector_store %arg7[%c0_26, %c0_27], %37 {strides = array<i32>} : memref<8x8xf32, #tpu.memory_space<vmem>>, vector<8x8xf32>,
    } else {
    }
    return
  }
  func.func @transform_0(%arg0: i32, %arg1: i32) -> (i32, i32) {
    %c0_i32 = arith.constant 0 : i32
    return %arg0, %arg1 : i32, i32
  }
  func.func @transform_1(%arg0: i32, %arg1: i32) -> (i32, i32) {
    %c0_i32 = arith.constant 0 : i32
    %c0_i32_0 = arith.constant 0 : i32
    return %arg1, %c0_i32 : i32, i32
  }
  func.func @transform_2(%arg0: i32, %arg1: i32) -> (i32, i32) {
    %c0_i32 = arith.constant 0 : i32
    %c0_i32_0 = arith.constant 0 : i32
    %c0_i32_1 = arith.constant 0 : i32
    return %c0_i32, %c0_i32_0 : i32, i32
  }
  func.func @transform_3(%arg0: i32, %arg1: i32) -> (i32, i32) {
    %c0_i32 = arith.constant 0 : i32
    %c0_i32_0 = arith.constant 0 : i32
    %c0_i32_1 = arith.constant 0 : i32
    return %c0_i32, %c0_i32_0 : i32, i32
  }
  func.func @transform_4(%arg0: i32, %arg1: i32) -> (i32, i32) {
    %c0_i32 = arith.constant 0 : i32
    %c0_i32_0 = arith.constant 0 : i32
    %c0_i32_1 = arith.constant 0 : i32
    return %c0_i32, %c0_i32_0 : i32, i32
  }
  func.func @transform_5(%arg0: i32, %arg1: i32) -> (i32, i32) {
    %c0_i32 = arith.constant 0 : i32
    %c0_i32_0 = arith.constant 0 : i32
    return %arg0, %c0_i32 : i32, i32
  }
}

module attributes {stable_mosaic.version = 11 : i64} {
  func.func @mlp_kernel(%arg0: i32, %arg1: i32, %arg2: memref<8x32xbf16, #tpu.memory_space<vmem>>, %arg3: memref<32x64xbf16, #tpu.memory_space<vmem>>, %arg4: memref<3x64xf32, #tpu.memory_space<vmem>>, %arg5: memref<64x32xbf16, #tpu.memory_space<vmem>>, %arg6: memref<32x8xbf16, #tpu.memory_space<vmem>>, %arg7: memref<8x8xf32, #tpu.memory_space<vmem>>, %arg8: memref<8x64xf32, #tpu.memory_space<vmem>>) attributes {dimension_semantics = [#tpu.dimension_semantics<parallel>, #tpu.dimension_semantics<arbitrary>], iteration_bounds = array<i64: 3, 1>, scalar_prefetch = 0 : i64, scratch_operands = 1 : i64, tpu.core_type = #tpu.core_type<tc>, window_params = [{transform_indices = @transform_0, window_bounds = array<i64: 8, 32>}, {transform_indices = @transform_1, window_bounds = array<i64: 32, 64>}, {pipeline_mode = #tpu.pipeline_mode<synchronous>, transform_indices = @transform_2, window_bounds = array<i64: 3, 64>}, {pipeline_mode = #tpu.pipeline_mode<synchronous>, transform_indices = @transform_3, window_bounds = array<i64: 64, 32>}, {pipeline_mode = #tpu.pipeline_mode<synchronous>, transform_indices = @transform_4, window_bounds = array<i64: 32, 8>}, {transform_indices = @transform_5, window_bounds = array<i64: 8, 8>}]} {
    %c0_i32 = arith.constant 0 : i32
    %0 = arith.cmpi eq, %arg1, %c0_i32 : i32
    %1 = arith.extui %0 : i1 to i32
    %c0_i32_0 = arith.constant 0 : i32
    %2 = arith.cmpi ne, %1, %c0_i32_0 : i32
    scf.if %2 {
      %cst_10 = arith.constant 0.000000e+00 : f32
      %12 = vector.broadcast %cst_10 : f32 to vector<8x64xf32>
      %c0_11 = arith.constant 0 : index
      %c0_12 = arith.constant 0 : index
      %13 = vector.load %arg8[%c0_11, %c0_12] : memref<8x64xf32, #tpu.memory_space<vmem>>, vector<8x64xf32>
      tpu.vector_store %arg8[%c0_11, %c0_12], %12 {strides = array<i32>} : memref<8x64xf32, #tpu.memory_space<vmem>>, vector<8x64xf32>,
    } else {
    }
    %c0 = arith.constant 0 : index
    %c0_1 = arith.constant 0 : index
    %3 = vector.load %arg8[%c0, %c0_1] : memref<8x64xf32, #tpu.memory_space<vmem>>, vector<8x64xf32>
    %c0_2 = arith.constant 0 : index
    %c0_3 = arith.constant 0 : index
    %4 = vector.load %arg2[%c0_2, %c0_3] : memref<8x32xbf16, #tpu.memory_space<vmem>>, vector<8x32xbf16>
    %c0_4 = arith.constant 0 : index
    %c0_5 = arith.constant 0 : index
    %5 = vector.load %arg3[%c0_4, %c0_5] : memref<32x64xbf16, #tpu.memory_space<vmem>>, vector<32x64xbf16>
    %cst = arith.constant dense<0.000000e+00> : vector<8x64xf32>
    %6 = tpu.matmul %4, %5, %cst {dimension_numbers = #tpu.dot_dimension_numbers<[1], [0], [0], [1], [0, 0, 1, 1], [], []>} : vector<8x32xbf16>, vector<32x64xbf16>, vector<8x64xf32> -> vector<8x64xf32>
    %7 = arith.addf %3, %6 : vector<8x64xf32>
    %c0_6 = arith.constant 0 : index
    %c0_7 = arith.constant 0 : index
    %8 = vector.load %arg8[%c0_6, %c0_7] : memref<8x64xf32, #tpu.memory_space<vmem>>, vector<8x64xf32>
    tpu.vector_store %arg8[%c0_6, %c0_7], %7 {strides = array<i32>} : memref<8x64xf32, #tpu.memory_space<vmem>>, vector<8x64xf32>,
    %c0_i32_8 = arith.constant 0 : i32
    %9 = arith.cmpi eq, %arg1, %c0_i32_8 : i32
    %10 = arith.extui %9 : i1 to i32
    %c0_i32_9 = arith.constant 0 : i32
    %11 = arith.cmpi ne, %10, %c0_i32_9 : i32
    scf.if %11 {
      %c0_10 = arith.constant 0 : index
      %c0_11 = arith.constant 0 : index
      %12 = vector.load %arg4[%c0_10, %c0_11] : memref<3x64xf32, #tpu.memory_space<vmem>>, vector<1x64xf32>
      %c1 = arith.constant 1 : index
      %c0_12 = arith.constant 0 : index
      %13 = vector.load %arg4[%c1, %c0_12] : memref<3x64xf32, #tpu.memory_space<vmem>>, vector<1x32xf32>
      %c2 = arith.constant 2 : index
      %c0_13 = arith.constant 0 : index
      %14 = vector.load %arg4[%c2, %c0_13] : memref<3x64xf32, #tpu.memory_space<vmem>>, vector<1x8xf32>
      %c0_14 = arith.constant 0 : index
      %c0_15 = arith.constant 0 : index
      %15 = vector.load %arg8[%c0_14, %c0_15] : memref<8x64xf32, #tpu.memory_space<vmem>>, vector<8x64xf32>
      %16 = vector.broadcast %12 : vector<1x64xf32> to vector<8x64xf32>
      %17 = arith.addf %15, %16 : vector<8x64xf32>
      %cst_16 = arith.constant 0.000000e+00 : f32
      %18 = vector.broadcast %cst_16 : f32 to vector<8x64xf32>
      %19 = arith.cmpf ogt, %17, %18 : vector<8x64xf32>
      %cst_17 = arith.constant 0.00999999977 : f32
      %20 = vector.broadcast %cst_17 : f32 to vector<8x64xf32>
      %21 = arith.mulf %20, %17 : vector<8x64xf32>
      %22 = arith.select %19, %17, %21 : vector<8x64xi1>, vector<8x64xf32>
      %23 = arith.truncf %22 : vector<8x64xf32> to vector<8x64xbf16>
      %c0_18 = arith.constant 0 : index
      %c0_19 = arith.constant 0 : index
      %24 = vector.load %arg5[%c0_18, %c0_19] : memref<64x32xbf16, #tpu.memory_space<vmem>>, vector<64x32xbf16>
      %cst_20 = arith.constant dense<0.000000e+00> : vector<8x32xf32>
      %25 = tpu.matmul %23, %24, %cst_20 {dimension_numbers = #tpu.dot_dimension_numbers<[1], [0], [0], [1], [0, 0, 1, 1], [], []>} : vector<8x64xbf16>, vector<64x32xbf16>, vector<8x32xf32> -> vector<8x32xf32>
      %26 = vector.broadcast %13 : vector<1x32xf32> to vector<8x32xf32>
      %27 = arith.addf %25, %26 : vector<8x32xf32>
      %cst_21 = arith.constant 0.000000e+00 : f32
      %28 = vector.broadcast %cst_21 : f32 to vector<8x32xf32>
      %29 = arith.cmpf ogt, %27, %28 : vector<8x32xf32>
      %cst_22 = arith.constant 0.00999999977 : f32
      %30 = vector.broadcast %cst_22 : f32 to vector<8x32xf32>
      %31 = arith.mulf %30, %27 : vector<8x32xf32>
      %32 = arith.select %29, %27, %31 : vector<8x32xi1>, vector<8x32xf32>
      %33 = arith.truncf %32 : vector<8x32xf32> to vector<8x32xbf16>
      %c0_23 = arith.constant 0 : index
      %c0_24 = arith.constant 0 : index
      %34 = vector.load %arg6[%c0_23, %c0_24] : memref<32x8xbf16, #tpu.memory_space<vmem>>, vector<32x8xbf16>
      %cst_25 = arith.constant dense<0.000000e+00> : vector<8x8xf32>
      %35 = tpu.matmul %33, %34, %cst_25 {dimension_numbers = #tpu.dot_dimension_numbers<[1], [0], [0], [1], [0, 0, 1, 1], [], []>} : vector<8x32xbf16>, vector<32x8xbf16>, vector<8x8xf32> -> vector<8x8xf32>
      %36 = vector.broadcast %14 : vector<1x8xf32> to vector<8x8xf32>
      %37 = arith.addf %35, %36 : vector<8x8xf32>
      %c0_26 = arith.constant 0 : index
      %c0_27 = arith.constant 0 : index
      %38 = vector.load %arg7[%c0_26, %c0_27] : memref<8x8xf32, #tpu.memory_space<vmem>>, vector<8x8xf32>
      tpu.vector_store %arg7[%c0_26, %c0_27], %37 {strides = array<i32>} : memref<8x8xf32, #tpu.memory_space<vmem>>, vector<8x8xf32>,
    } else {
    }
    return
  }
  func.func @transform_0(%arg0: i32, %arg1: i32) -> (i32, i32) {
    %c0_i32 = arith.constant 0 : i32
    return %arg0, %arg1 : i32, i32
  }
  func.func @transform_1(%arg0: i32, %arg1: i32) -> (i32, i32) {
    %c0_i32 = arith.constant 0 : i32
    %c0_i32_0 = arith.constant 0 : i32
    return %arg1, %c0_i32 : i32, i32
  }
  func.func @transform_2(%arg0: i32, %arg1: i32) -> (i32, i32) {
    %c0_i32 = arith.constant 0 : i32
    %c0_i32_0 = arith.constant 0 : i32
    %c0_i32_1 = arith.constant 0 : i32
    return %c0_i32, %c0_i32_0 : i32, i32
  }
  func.func @transform_3(%arg0: i32, %arg1: i32) -> (i32, i32) {
    %c0_i32 = arith.constant 0 : i32
    %c0_i32_0 = arith.constant 0 : i32
    %c0_i32_1 = arith.constant 0 : i32
    return %c0_i32, %c0_i32_0 : i32, i32
  }
  func.func @transform_4(%arg0: i32, %arg1: i32) -> (i32, i32) {
    %c0_i32 = arith.constant 0 : i32
    %c0_i32_0 = arith.constant 0 : i32
    %c0_i32_1 = arith.constant 0 : i32
    return %c0_i32, %c0_i32_0 : i32, i32
  }
  func.func @transform_5(%arg0: i32, %arg1: i32) -> (i32, i32) {
    %c0_i32 = arith.constant 0 : i32
    %c0_i32_0 = arith.constant 0 : i32
    return %arg0, %c0_i32 : i32, i32
  }
}

</mosaic_0001>

<bundles_post_ra>
// kernel: tpu_custom_call.1
= control target key start
LH: loop header
LB: loop body
LE: loop exit
PB: predicated region body
PF: predicated region fallthrough
CT: control target
= control target key end

     0   :  { %s734_s18 = smov 0   ;;  %s736_s19 = smov 0   ;;  %s809_s0 = inlined_call_operand.vmem [shape: bf16[24,32], index: 0, kind: input, shape index: {}]   ;;  %s810_s1 = inlined_call_operand.vmem [shape: bf16[32,64], index: 1, kind: input, shape index: {}]   ;;  %s811_s2 = inlined_call_operand.vmem [shape: f32[3,64], index: 2, kind: input, shape index: {}]   ;;  %s812_s3 = inlined_call_operand.vmem [shape: bf16[64,32], index: 3, kind: input, shape index: {}]   ;;  %s813_s4 = inlined_call_operand.vmem [shape: bf16[32,8], index: 4, kind: input, shape index: {}]   ;;  %s814_s5 = inlined_call_operand.vmem [shape: f32[24,8], index: 5, kind: output, shape index: {}]  }
   0x1   :  { %s738_s20 = smov 0  }
   0x2 LB: > { %s27_s21 = sadd.s32 1, %s696_s19  ;;  %p586_p0 = scmp.ge.s32.totalorder %s700_s20, 1  ;;  %s700_s20 = sphi %s738_s20, %s15_s20   ;;  %s696_s19 = sphi %s736_s19, %s816_s19   ;;  %s692_s18 = sphi %s734_s18, %s815_s18  }
   0x3   : > { %p29_p1 = scmp.ge.s32.totalorder %s27_s21, 3  ;;  %p214_p2 = scmp.lt.s32.totalorder %s700_s20, 4 }
   0x5   : > { %s818_s21 = smov (%p29_p1, %s27_s21), 0  ;;  %p215_p3 = pnand %p586_p0, %p214_p2 }
   0x6   : > { %v670_v0 = vld [vmem:[%s810_s1] sm:$0xff] (!%p215_p3)   ;;  %v702_v1 = vmov (!%p215_p3), 0.0   ;;  %v671_v2 = vld [vmem:[%s810_s1 + $0x8] sm:$0xff] (!%p215_p3)   ;;  %vm703_vm0 = vmmov (!%p215_p3), 0   ;;  %p248_p4 = scmp.lt.s32.totalorder (!%p215_p3), %s692_s18, 2  ;;  %vm270_vm1 = vcmask (!%p215_p3), 523264  }
   0x7   : > { %218 = sbr.rel (%p215_p3) target bundleno = 681 (0x2a9), region = 40  ;;  %616 = vmatprep.subr.bf16.mxu0 (!%p215_p3), %v702_v1  ;;  %624 = vmatprep.subr.bf16.mxu1 (!%p215_p3), %v702_v1  ;;  %271 = vst.msk [vmem:[#allocation2] sm:$0xff] (!%p215_p3), %vm270_vm1, %v702_v1  ;;  %vm290_vm2 = vcmask (!%p215_p3), 261120   ;;  %v672_v4 = vld [vmem:[%s812_s3] sm:$0xff] (!%p215_p3)   ;;  %v673_v5 = vld [vmem:[%s812_s3 + $0x8] sm:$0xff] (!%p215_p3)   ;;  %v674_v6 = vld [vmem:[%s812_s3 + $0x10] sm:$0xff] (!%p215_p3)  }
   0x8   : > { %617 = vmatpush3.bf16.msra.mxu0 (!%p215_p3), %v670_v0  ;;  %620 = vmatprep.mubr.msk.bf16.mxu0 (!%p215_p3), %vm703_vm0, %v702_v1  ;;  %v675_v7 = vld [vmem:[%s812_s3 + $0x18] sm:$0xff] (!%p215_p3)   ;;  %v592_v14 = vld [vmem:[%s811_s2] ss:$0 sm:$0xff] (!%p215_p3)  ;;  %v677_v21 = vld [vmem:[%s813_s4 + $0x8] sm:$0xff] (!%p215_p3)   ;;  %vm499_vm5 = vcmask (!%p215_p3), 64512  }
   0x9   : > { %618 = vmatprep.subr.bf16.mxu0 (!%p215_p3), %v702_v1  ;;  %632 = vmatprep.mubr.msk.bf16.mxu1 (!%p215_p3), %vm703_vm0, %v702_v1  ;;  %v676_v20 = vld [vmem:[%s813_s4] sm:$0xff] (!%p215_p3)  }
   0xa   : > { %625 = vmatpush3.bf16.msra.mxu1 (!%p215_p3), %v672_v4  ;;  %v593_v22 = vld [vmem:[%s811_s2 + $0x1] ss:$0 sm:$0xff] (!%p215_p3)  ;;  %v599_v31 = vld [vmem:[%s811_s2 + $0x2] ss:$0 sm:$0xff] (!%p215_p3) }
   0xb   : > { %626 = vmatprep.subr.bf16.mxu1 (!%p215_p3), %v702_v1 }
   0xc   : > { %619 = vmatpush3.bf16.msra.mxu0 (!%p215_p3), %v671_v2 }
   0xd   : > { %636 = vmatprep.subr.bf16.mxu0 (!%p215_p3), %v702_v1 }
   0xe   : > { %s820_s18 = smov (!%p248_p4, %s692_s18), 2  ;;  %627 = vmatpush3.bf16.msra.mxu1 %v673_v5  ;;  %v272_v8 = vld [vmem:[#allocation2] sm:$0xff] }
   0xf   : > { %s587_s26 = sshll.u32 %s820_s18, 2  ;;  %628 = vmatprep.subr.bf16.mxu1 %v702_v1  ;;  %s588_s25 = sshll.u32 %s820_s18, 3 }
  0x10   : > { %s254_s29 = scalar_lea.vmem %s809_s0, %s587_s26  ;;  %s264_s30 = scalar_lea.vmem %s814_s5, %s588_s25 }
  0x11   : > { %v273_v3 = vld [vmem:[%s254_s29] sm:$0xf] }
  0x12   : > { %621 = vmatmul.mubr.msk.bf16.vlgmr.msra.gmra.mrb[0].mxu0 %vm290_vm2, %v273_v3  ;;  %629 = vmatpush3.bf16.msra.mxu1 %v674_v6 }
  0x13   : > { %640 = vmatprep.mubr.msk.bf16.mxu0 %vm703_vm0, %v702_v1  ;;  %630 = vmatprep.subr.bf16.mxu1 %v702_v1 }
  0x14   : > { %637 = vmatpush3.bf16.msra.mxu0 %v676_v20 }
  0x15   : > { %638 = vmatprep.subr.bf16.mxu0 %v702_v1 }
  0x16   : > { %631 = vmatpush3.bf16.msra.mxu1 %v675_v7 }
  0x18   : > { %639 = vmatpush3.bf16.msra.mxu0 %v677_v21 }
  0xe5   : > { %v328_v9 = vpop.f32.mrb[0].mxu0 }
  0xe6   : > { %v334_v10 = vadd.f32 %v328_v9, %v272_v8  ;;  %v622_v11 = vpop.f32.mrb[1].mxu0 }
  0xe7   : > { %v331_v12 = vpop.f32.mrb[2].mxu0 }
  0xe8   : > { %336 = vst.msk [vmem:[#allocation2] sm:$0xff] %vm270_vm1, %v334_v10  ;;  %v623_v13 = vpop.f32.mrb[3].mxu0 }
  0xef   : > { %v343_v15 = vld [vmem:[#allocation2] sm:$0xff] }
  0xf0   : > { %v348_v16 = vadd.f32 %v592_v14, %v343_v15 }
  0xf2   : > { %vm349_vm3 = vcmp.gt.f32.partialorder %v348_v16, 0.0  ;;  %v350_v17 = vmul.f32 0.01, %v348_v16 }
  0xf4   : > { %v351_v18 = vsel %vm349_vm3, %v348_v16, %v350_v17 }
  0xf5   : > { %v352_v19 = vpack.c.bf16 %v351_v18, %v351_v18 }
  0xf7   : > { %633 = vmatmul.mubr.msk.bf16.vlgmr.msra.gmra.mrb[0].mxu1 %vm270_vm1, %v352_v19 }
 0x1ca   : > { %v426_v23 = vpop.f32.mrb[0].mxu1 }
 0x1cb   : > { %v427_v24 = vadd.f32 %v593_v22, %v426_v23  ;;  %v634_v25 = vpop.f32.mrb[1].mxu1 }
 0x1cc   : > { %v429_v26 = vpop.f32.mrb[2].mxu1 }
 0x1cd   : > { %vm432_vm4 = vcmp.gt.f32.partialorder %v427_v24, 0.0  ;;  %v433_v27 = vmul.f32 0.01, %v427_v24  ;;  %v635_v28 = vpop.f32.mrb[3].mxu1 }
 0x1cf   : > { %v434_v29 = vsel %vm432_vm4, %v427_v24, %v433_v27 }
 0x1d0   : > { %v435_v30 = vpack.c.bf16 %v434_v29, %v434_v29 }
 0x1d2   : > { %641 = vmatmul.mubr.msk.bf16.vlgmr.msra.gmra.mrb[4].mxu0 %vm290_vm2, %v435_v30 }
 0x2a5   : > { %v493_v32 = vpop.f32.mrb[4].mxu0 }
 0x2a6   : > { %v494_v33 = vadd.f32 %v599_v31, %v493_v32  ;;  %v642_v34 = vpop.f32.mrb[5].mxu0 }
 0x2a7   : > { %v496_v35 = vpop.f32.mrb[6].mxu0 }
 0x2a8   : > { %500 = vst.msk [vmem:[%s264_s30] sm:$0xff] %vm499_vm5, %v494_v33  ;;  %v643_v36 = vpop.f32.mrb[7].mxu0 }
 0x2a9 PF: > { %s15_s20 = sadd.s32 1, %s700_s20   ;;  %s815_s18 = smov %s696_s19 }
 0x2aa   : > { %p12_p5 = scmp.ge.s32.totalorder %s15_s20, 5   ;;  %s816_s19 = smov %s818_s21 }
 0x2ac   :  { %14 = sbr.rel (!%p12_p5) target bundleno = 2 (0x2), region = 81 }

// kernel: tpu_custom_call.1
= control target key start
LH: loop header
LB: loop body
LE: loop exit
PB: predicated region body
PF: predicated region fallthrough
CT: control target
= control target key end

     0   :  { %s734_s18 = smov 0   ;;  %s736_s19 = smov 0   ;;  %s809_s0 = inlined_call_operand.vmem [shape: bf16[24,32], index: 0, kind: input, shape index: {}]   ;;  %s810_s1 = inlined_call_operand.vmem [shape: bf16[32,64], index: 1, kind: input, shape index: {}]   ;;  %s811_s2 = inlined_call_operand.vmem [shape: f32[3,64], index: 2, kind: input, shape index: {}]   ;;  %s812_s3 = inlined_call_operand.vmem [shape: bf16[64,32], index: 3, kind: input, shape index: {}]   ;;  %s813_s4 = inlined_call_operand.vmem [shape: bf16[32,8], index: 4, kind: input, shape index: {}]   ;;  %s814_s5 = inlined_call_operand.vmem [shape: f32[24,8], index: 5, kind: output, shape index: {}]  }
   0x1   :  { %s738_s20 = smov 0  }
   0x2 LB: > { %s27_s21 = sadd.s32 1, %s696_s19  ;;  %p586_p0 = scmp.ge.s32.totalorder %s700_s20, 1  ;;  %s700_s20 = sphi %s738_s20, %s15_s20   ;;  %s696_s19 = sphi %s736_s19, %s816_s19   ;;  %s692_s18 = sphi %s734_s18, %s815_s18  }
   0x3   : > { %p29_p1 = scmp.ge.s32.totalorder %s27_s21, 3  ;;  %p214_p2 = scmp.lt.s32.totalorder %s700_s20, 4 }
   0x5   : > { %s818_s21 = smov (%p29_p1, %s27_s21), 0  ;;  %p215_p3 = pnand %p586_p0, %p214_p2 }
   0x6   : > { %v670_v0 = vld [vmem:[%s810_s1] sm:$0xff] (!%p215_p3)   ;;  %v702_v1 = vmov (!%p215_p3), 0.0   ;;  %v671_v2 = vld [vmem:[%s810_s1 + $0x8] sm:$0xff] (!%p215_p3)   ;;  %vm703_vm0 = vmmov (!%p215_p3), 0   ;;  %p248_p4 = scmp.lt.s32.totalorder (!%p215_p3), %s692_s18, 2  ;;  %vm270_vm1 = vcmask (!%p215_p3), 523264  }
   0x7   : > { %218 = sbr.rel (%p215_p3) target bundleno = 681 (0x2a9), region = 40  ;;  %616 = vmatprep.subr.bf16.mxu0 (!%p215_p3), %v702_v1  ;;  %624 = vmatprep.subr.bf16.mxu1 (!%p215_p3), %v702_v1  ;;  %271 = vst.msk [vmem:[#allocation2] sm:$0xff] (!%p215_p3), %vm270_vm1, %v702_v1  ;;  %vm290_vm2 = vcmask (!%p215_p3), 261120   ;;  %v672_v4 = vld [vmem:[%s812_s3] sm:$0xff] (!%p215_p3)   ;;  %v673_v5 = vld [vmem:[%s812_s3 + $0x8] sm:$0xff] (!%p215_p3)   ;;  %v674_v6 = vld [vmem:[%s812_s3 + $0x10] sm:$0xff] (!%p215_p3)  }
   0x8   : > { %617 = vmatpush3.bf16.msra.mxu0 (!%p215_p3), %v670_v0  ;;  %620 = vmatprep.mubr.msk.bf16.mxu0 (!%p215_p3), %vm703_vm0, %v702_v1  ;;  %v675_v7 = vld [vmem:[%s812_s3 + $0x18] sm:$0xff] (!%p215_p3)   ;;  %v592_v14 = vld [vmem:[%s811_s2] ss:$0 sm:$0xff] (!%p215_p3)  ;;  %v677_v21 = vld [vmem:[%s813_s4 + $0x8] sm:$0xff] (!%p215_p3)   ;;  %vm499_vm5 = vcmask (!%p215_p3), 64512  }
   0x9   : > { %618 = vmatprep.subr.bf16.mxu0 (!%p215_p3), %v702_v1  ;;  %632 = vmatprep.mubr.msk.bf16.mxu1 (!%p215_p3), %vm703_vm0, %v702_v1  ;;  %v676_v20 = vld [vmem:[%s813_s4] sm:$0xff] (!%p215_p3)  }
   0xa   : > { %625 = vmatpush3.bf16.msra.mxu1 (!%p215_p3), %v672_v4  ;;  %v593_v22 = vld [vmem:[%s811_s2 + $0x1] ss:$0 sm:$0xff] (!%p215_p3)  ;;  %v599_v31 = vld [vmem:[%s811_s2 + $0x2] ss:$0 sm:$0xff] (!%p215_p3) }
   0xb   : > { %626 = vmatprep.subr.bf16.mxu1 (!%p215_p3), %v702_v1 }
   0xc   : > { %619 = vmatpush3.bf16.msra.mxu0 (!%p215_p3), %v671_v2 }
   0xd   : > { %636 = vmatprep.subr.bf16.mxu0 (!%p215_p3), %v702_v1 }
   0xe   : > { %s820_s18 = smov (!%p248_p4, %s692_s18), 2  ;;  %627 = vmatpush3.bf16.msra.mxu1 %v673_v5  ;;  %v272_v8 = vld [vmem:[#allocation2] sm:$0xff] }
   0xf   : > { %s587_s26 = sshll.u32 %s820_s18, 2  ;;  %628 = vmatprep.subr.bf16.mxu1 %v702_v1  ;;  %s588_s25 = sshll.u32 %s820_s18, 3 }
  0x10   : > { %s254_s29 = scalar_lea.vmem %s809_s0, %s587_s26  ;;  %s264_s30 = scalar_lea.vmem %s814_s5, %s588_s25 }
  0x11   : > { %v273_v3 = vld [vmem:[%s254_s29] sm:$0xf] }
  0x12   : > { %621 = vmatmul.mubr.msk.bf16.vlgmr.msra.gmra.mrb[0].mxu0 %vm290_vm2, %v273_v3  ;;  %629 = vmatpush3.bf16.msra.mxu1 %v674_v6 }
  0x13   : > { %640 = vmatprep.mubr.msk.bf16.mxu0 %vm703_vm0, %v702_v1  ;;  %630 = vmatprep.subr.bf16.mxu1 %v702_v1 }
  0x14   : > { %637 = vmatpush3.bf16.msra.mxu0 %v676_v20 }
  0x15   : > { %638 = vmatprep.subr.bf16.mxu0 %v702_v1 }
  0x16   : > { %631 = vmatpush3.bf16.msra.mxu1 %v675_v7 }
  0x18   : > { %639 = vmatpush3.bf16.msra.mxu0 %v677_v21 }
  0xe5   : > { %v328_v9 = vpop.f32.mrb[0].mxu0 }
  0xe6   : > { %v334_v10 = vadd.f32 %v328_v9, %v272_v8  ;;  %v622_v11 = vpop.f32.mrb[1].mxu0 }
  0xe7   : > { %v331_v12 = vpop.f32.mrb[2].mxu0 }
  0xe8   : > { %336 = vst.msk [vmem:[#allocation2] sm:$0xff] %vm270_vm1, %v334_v10  ;;  %v623_v13 = vpop.f32.mrb[3].mxu0 }
  0xef   : > { %v343_v15 = vld [vmem:[#allocation2] sm:$0xff] }
  0xf0   : > { %v348_v16 = vadd.f32 %v592_v14, %v343_v15 }
  0xf2   : > { %vm349_vm3 = vcmp.gt.f32.partialorder %v348_v16, 0.0  ;;  %v350_v17 = vmul.f32 0.01, %v348_v16 }
  0xf4   : > { %v351_v18 = vsel %vm349_vm3, %v348_v16, %v350_v17 }
  0xf5   : > { %v352_v19 = vpack.c.bf16 %v351_v18, %v351_v18 }
  0xf7   : > { %633 = vmatmul.mubr.msk.bf16.vlgmr.msra.gmra.mrb[0].mxu1 %vm270_vm1, %v352_v19 }
 0x1ca   : > { %v426_v23 = vpop.f32.mrb[0].mxu1 }
 0x1cb   : > { %v427_v24 = vadd.f32 %v593_v22, %v426_v23  ;;  %v634_v25 = vpop.f32.mrb[1].mxu1 }
 0x1cc   : > { %v429_v26 = vpop.f32.mrb[2].mxu1 }
 0x1cd   : > { %vm432_vm4 = vcmp.gt.f32.partialorder %v427_v24, 0.0  ;;  %v433_v27 = vmul.f32 0.01, %v427_v24  ;;  %v635_v28 = vpop.f32.mrb[3].mxu1 }
 0x1cf   : > { %v434_v29 = vsel %vm432_vm4, %v427_v24, %v433_v27 }
 0x1d0   : > { %v435_v30 = vpack.c.bf16 %v434_v29, %v434_v29 }
 0x1d2   : > { %641 = vmatmul.mubr.msk.bf16.vlgmr.msra.gmra.mrb[4].mxu0 %vm290_vm2, %v435_v30 }
 0x2a5   : > { %v493_v32 = vpop.f32.mrb[4].mxu0 }
 0x2a6   : > { %v494_v33 = vadd.f32 %v599_v31, %v493_v32  ;;  %v642_v34 = vpop.f32.mrb[5].mxu0 }
 0x2a7   : > { %v496_v35 = vpop.f32.mrb[6].mxu0 }
 0x2a8   : > { %500 = vst.msk [vmem:[%s264_s30] sm:$0xff] %vm499_vm5, %v494_v33  ;;  %v643_v36 = vpop.f32.mrb[7].mxu0 }
 0x2a9 PF: > { %s15_s20 = sadd.s32 1, %s700_s20   ;;  %s815_s18 = smov %s696_s19 }
 0x2aa   : > { %p12_p5 = scmp.ge.s32.totalorder %s15_s20, 5   ;;  %s816_s19 = smov %s818_s21 }
 0x2ac   :  { %14 = sbr.rel (!%p12_p5) target bundleno = 2 (0x2), region = 81 }

</bundles_post_ra>
